<compile_context>
chip_gen: v6e
topology: v6e:2x2x1
jax: 0.10.0
libtpu: 0.0.40
codegen_flags: <defaults>
</compile_context>

<pallas_src>
import functools

import jax
import jax.numpy as jnp
from jax import lax
from jax.experimental import pallas as pl
from jax.experimental.pallas import tpu as pltpu

LOGIT_SCALE = 1.0 / 0.07        # logit_scale_method='fixed'
BN_EPS = 1e-5


def _visual_head(x_ref, w1_ref, b1_ref, w2_ref, b2_ref, logit_scale):
    """Visual projection for one TB-row block: avg-pool (1/HW pre-folded into w1) ->
    Linear -> folded-eval-BN -> ReLU -> Linear -> scaled L2 normalization."""
    x = x_ref[...].astype(jnp.float32)                  # cast up right after load (v5e: no bf16 VPU)
    pooled = jnp.sum(x, axis=-1)                        # (TB, C); the 1/HW is folded into w1
    h = jnp.dot(pooled, w1_ref[...],
                preferred_element_type=jnp.float32) + b1_ref[...]    # (TB, Hd)
    h = jnp.maximum(h, 0.0)                             # ReLU (eval-BN folded into w1/b1)
    v = jnp.dot(h, w2_ref[...],
                preferred_element_type=jnp.float32) + b2_ref[...]    # (TB, E)
    # logit_scale folded into the normalization factor; rsqrt lowers to the EUP slot.
    # (rsqrt of an exactly-zero row gives inf, same as the torch/JAX reference.)
    return v * (lax.rsqrt(jnp.sum(v * v, axis=-1, keepdims=True)) * logit_scale)


def _ctx_classify_shared_kernel(x_ref, cnt_ref, w1_ref, b1_ref, w2_ref, b2_ref, y_ref,
                                *, logit_scale):
    """Batch-shared class embeddings: cnt_ref is the resident, pre-normalized (E, K)
    class matrix. One (TB,E)@(E,K) matmul per grid step."""
    v_s = _visual_head(x_ref, w1_ref, b1_ref, w2_ref, b2_ref, logit_scale)        # (TB, E)
    y_ref[...] = jnp.dot(v_s, cnt_ref[...], preferred_element_type=jnp.float32)   # (TB, K)


def _ctx_classify_batched_kernel(x_ref, c_ref, w1_ref, b1_ref, w2_ref, b2_ref, y_ref,
                                 *, logit_scale):
    """Per-batch class embeddings (TB, K, E): VPU broadcast-multiply + lane reduce
    instead of an M=1 batched matmul (kernel is HBM-bound; VALU/XLU have slack)."""
    v_s = _visual_head(x_ref, w1_ref, b1_ref, w2_ref, b2_ref, logit_scale)         # (TB, E)
    cm = c_ref[...].astype(jnp.float32)                                            # (TB, K, E)
    c_n = cm * lax.rsqrt(jnp.sum(cm * cm, axis=-1, keepdims=True))
    y_ref[...] = jnp.sum(v_s[:, None, :] * c_n, axis=-1)                           # (TB, K)


def _choose_tb(B, per_row_bytes, *, block_budget_bytes=36 * 1024 * 1024):
    """Batch-block size: sublane aligned, big enough to amortize per-step overhead,
    capped by a double-buffered VMEM budget, and kept small enough that the grid has
    at least 2 steps (so the 'parallel' batch axis shards across both v7x cores)."""
    if B <= 8:
        return B                                        # full-dim block is always legal
    cap = max(8, block_budget_bytes // max(per_row_bytes, 1))
    tb = min(B, 512, cap)
    tb = min(tb, max(8, (pl.cdiv(B, 2) // 8) * 8))      # >= 2 grid steps when B > 8
    return max(8, (tb // 8) * 8)


def contextualizing_forward(x, c, params, *, x_dtype=jnp.float32):
    """x: (B, C, H, W) NCHW float; c: (K, E) shared or (B, K, E) per-batch class
    embeddings -> (y (B, K), c_sorted (B, K, E))."""
    B, C, H, W = x.shape
    HW = H * W
    shared_c = (c.ndim == 2)
    if shared_c:
        K, E = c.shape
    else:
        assert c.shape[0] == B
        _, K, E = c.shape

    w1 = jnp.asarray(params["w1"], jnp.float32)
    b1 = jnp.asarray(params["b1"], jnp.float32)
    w2 = jnp.asarray(params["w2"], jnp.float32)
    b2 = jnp.asarray(params["b2"], jnp.float32)
    Hd = w1.shape[1]

    # Fold eval-BatchNorm1d (general running-stats form) and the avg-pool 1/HW into
    # linear-1 on the wrapper side. Identity stats (mean=0, var=1, gamma=1, beta=0)
    # reproduce the original assumption; a trained checkpoint's stats fold correctly.
    gamma = jnp.asarray(params.get("bn_gamma", jnp.ones((Hd,))), jnp.float32)
    beta = jnp.asarray(params.get("bn_beta", jnp.zeros((Hd,))), jnp.float32)
    mean = jnp.asarray(params.get("bn_mean", jnp.zeros((Hd,))), jnp.float32)
    var = jnp.asarray(params.get("bn_var", jnp.ones((Hd,))), jnp.float32)
    s = gamma / jnp.sqrt(var + BN_EPS)
    w1f = (w1 * s[None, :]) * (1.0 / HW)
    b1f = ((b1.reshape(1, Hd) - mean[None, :]) * s[None, :] + beta[None, :]).reshape(1, Hd)
    b2f = b2.reshape(1, E)

    x_flat = x.reshape(B, C, HW).astype(x_dtype)        # glue reshape: NCHW -> (B, C, HW)

    # Double-buffered bytes per batch row (x dominates; c only if per-batch; y output).
    x_row = 2 * C * HW * jnp.dtype(x_dtype).itemsize
    c_row = 0 if shared_c else 2 * K * E * jnp.dtype(c.dtype).itemsize
    y_row = 2 * K * 4
    TB = _choose_tb(B, x_row + c_row + y_row)
    grid = (pl.cdiv(B, TB),)
    # NOTE: padded rows of a final partial block are computed row-wise and their
    # outputs dropped by Pallas; no op in the kernel mixes batch rows.

    x_spec = pl.BlockSpec((TB, C, HW), lambda b: (b, 0, 0))
    # TODO(synk): add pipeline_mode=pl.Buffered(3) on x_spec if traces show exposed DMA.
    weight_specs = [
        pl.BlockSpec((C, Hd), lambda b: (0, 0)),        # w1 (resident)
        pl.BlockSpec((1, Hd), lambda b: (0, 0)),        # b1 (resident)
        pl.BlockSpec((Hd, E), lambda b: (0, 0)),        # w2 (resident)
        pl.BlockSpec((1, E), lambda b: (0, 0)),         # b2 (resident)
    ]

    if shared_c:
        # Pre-normalize & transpose shared class embeddings once (one-time wrapper cost).
        c32 = jnp.asarray(c, jnp.float32)
        cnT = (c32 * lax.rsqrt(jnp.sum(c32 * c32, axis=-1, keepdims=True))).T   # (E, K)
        kernel = functools.partial(_ctx_classify_shared_kernel, logit_scale=LOGIT_SCALE)
        in_specs = [x_spec, pl.BlockSpec((E, K), lambda b: (0, 0))] + weight_specs
        args = (x_flat, cnT, w1f, b1f, w2, b2f)
    else:
        kernel = functools.partial(_ctx_classify_batched_kernel, logit_scale=LOGIT_SCALE)
        in_specs = [x_spec, pl.BlockSpec((TB, K, E), lambda b: (b, 0, 0))] + weight_specs
        args = (x_flat, jnp.asarray(c, jnp.float32), w1f, b1f, w2, b2f)

    y = pl.pallas_call(
        kernel,
        out_shape=jax.ShapeDtypeStruct((B, K), jnp.float32),
        grid_spec=pltpu.PrefetchScalarGridSpec(
            num_scalar_prefetch=0,
            grid=grid,
            in_specs=in_specs,
            out_specs=pl.BlockSpec((TB, K), lambda b: (b, 0)),   # lane-dense 2-D logits
        ),
        compiler_params=pltpu.CompilerParams(
            dimension_semantics=("parallel",),          # megacore-shardable batch axis
            vmem_limit_bytes=48 * 1024 * 1024,          # > v5e 16 MiB default, <= v7x 64 MiB
        ),
    )(*args)

    # torch.topk(y, num_classes) == full descending sort; gather c along the class dim.
    # TODO(synk): sort/gather kept in plain JAX (no clean single-kernel Pallas sort).
    idx = jnp.argsort(-y, axis=-1)                                   # (B, K)
    if shared_c:
        c_sorted = jnp.take(c, idx, axis=0)                          # (B, K, E)
    else:
        c_sorted = jnp.take_along_axis(c, idx[:, :, None], axis=1)   # (B, K, E)
    return y, c_sorted


def _reference_forward(x, c, params):
    """Pure-JAX reference (identity eval-BN stats, matching the driver's params)."""
    w1, b1, w2, b2 = params["w1"], params["b1"], params["w2"], params["b2"]
    bn_scale = 1.0 / jnp.sqrt(1.0 + BN_EPS)
    pooled = jnp.mean(x, axis=(2, 3))                                # (B, C)
    h = jnp.maximum((pooled @ w1 + b1) * bn_scale, 0.0)
    v = h @ w2 + b2                                                  # (B, E)
    v_n = v / jnp.linalg.norm(v, axis=-1, keepdims=True)
    c_b = jnp.broadcast_to(c[None], (x.shape[0],) + c.shape) if c.ndim == 2 else c
    c_n = c_b / jnp.linalg.norm(c_b, axis=-1, keepdims=True)
    y = LOGIT_SCALE * jnp.einsum("be,bke->bk", v_n, c_n,
                                 precision=jax.lax.Precision.HIGHEST)
    idx = jnp.argsort(-y, axis=-1)
    c_sorted = jnp.take_along_axis(c_b, idx[:, :, None], axis=1)
    return y, c_sorted


if __name__ == "__main__":
    # Small config consistent with the module:
    #   stage_idx=0 of ctx_layers=(True,), num_features=32 -> feature dim C=32,
    #   block_expansion=1 -> hidden=32, class_emb_dim E=32, num_classes K=8,
    #   input_resolution=64 -> this_resolution = 64 // 2**2 = 16.
    B, C, H, W = 2, 32, 16, 16
    K, E, HID = 8, 32, 32

    key = jax.random.PRNGKey(0)
    kx, kc, kcb, k1, k2, k3, k4 = jax.random.split(key, 7)

    x = jax.random.normal(kx, (B, C, H, W), dtype=jnp.float32)
    emb = 0.02 * jax.random.normal(kc, (K, E), dtype=jnp.float32)          # shared (CLIP-style init)
    c_batched = 0.02 * jax.random.normal(kcb, (B, K, E), dtype=jnp.float32)  # per-batch variant

    params = {
        "w1": jax.random.uniform(k1, (C, HID), jnp.float32, -1.0, 1.0) / (C ** 0.5),
        "b1": jax.random.uniform(k2, (1, HID), jnp.float32, -1.0, 1.0) / (C ** 0.5),
        "w2": jax.random.uniform(k3, (HID, E), jnp.float32, -1.0, 1.0) / (HID ** 0.5),
        "b2": jax.random.uniform(k4, (1, E), jnp.float32, -1.0, 1.0) / (HID ** 0.5),
    }

    # 1) Batch-shared class embeddings (the `generate()` case): resident (K, E) input.
    y, c_sorted = contextualizing_forward(x, emb, params)
    jax.block_until_ready((y, c_sorted))
    y_ref, c_sorted_ref = _reference_forward(x, emb, params)
    assert y.shape == (B, K) and c_sorted.shape == (B, K, E)
    assert jnp.allclose(y, y_ref, rtol=1e-3, atol=1e-3), "shared-c logit mismatch"
    assert jnp.allclose(c_sorted, c_sorted_ref, rtol=1e-5, atol=1e-5), "shared-c gather mismatch"

    # 2) Per-batch class embeddings (general module signature).
    y2, c2_sorted = contextualizing_forward(x, c_batched, params)
    jax.block_until_ready((y2, c2_sorted))
    y2_ref, c2_sorted_ref = _reference_forward(x, c_batched, params)
    assert jnp.allclose(y2, y2_ref, rtol=1e-3, atol=1e-3), "batched-c logit mismatch"
    assert jnp.allclose(c2_sorted, c2_sorted_ref, rtol=1e-5, atol=1e-5), "batched-c gather mismatch"

    # 3) Multi-step grid + partial final block + bf16 x stream (loose logit tolerance).
    B2 = 20
    x_big = jax.random.normal(jax.random.PRNGKey(1), (B2, C, H, W), dtype=jnp.float32)
    y3, _ = contextualizing_forward(x_big, emb, params, x_dtype=jnp.bfloat16)
    jax.block_until_ready(y3)
    y3_ref, _ = _reference_forward(x_big, emb, params)
    assert float(jnp.max(jnp.abs(y3 - y3_ref))) < 0.05 * LOGIT_SCALE, "bf16 logit mismatch"

    print("KERNEL_OK")
</pallas_src>

<mosaic_0001>
module attributes {stable_mosaic.version = 11 : i64} {
  func.func @_ctx_classify_shared_kernel(%arg0: i32, %arg1: memref<2x32x256xf32, #tpu.memory_space<vmem>>, %arg2: memref<32x8xf32, #tpu.memory_space<vmem>>, %arg3: memref<32x32xf32, #tpu.memory_space<vmem>>, %arg4: memref<1x32xf32, #tpu.memory_space<vmem>>, %arg5: memref<32x32xf32, #tpu.memory_space<vmem>>, %arg6: memref<1x32xf32, #tpu.memory_space<vmem>>, %arg7: memref<2x8xf32, #tpu.memory_space<vmem>>) attributes {dimension_semantics = [#tpu.dimension_semantics<parallel>], iteration_bounds = array<i64: 1>, scalar_prefetch = 0 : i64, scratch_operands = 0 : i64, tpu.core_type = #tpu.core_type<tc>, window_params = [{transform_indices = @transform_0, window_bounds = array<i64: 2, 32, 256>}, {pipeline_mode = #tpu.pipeline_mode<synchronous>, transform_indices = @transform_1, window_bounds = array<i64: 32, 8>}, {pipeline_mode = #tpu.pipeline_mode<synchronous>, transform_indices = @transform_2, window_bounds = array<i64: 32, 32>}, {pipeline_mode = #tpu.pipeline_mode<synchronous>, transform_indices = @transform_3, window_bounds = array<i64: 1, 32>}, {pipeline_mode = #tpu.pipeline_mode<synchronous>, transform_indices = @transform_4, window_bounds = array<i64: 32, 32>}, {pipeline_mode = #tpu.pipeline_mode<synchronous>, transform_indices = @transform_5, window_bounds = array<i64: 1, 32>}, {transform_indices = @transform_6, window_bounds = array<i64: 2, 8>}]} {
    %c0 = arith.constant 0 : index
    %c0_0 = arith.constant 0 : index
    %c0_1 = arith.constant 0 : index
    %0 = vector.load %arg1[%c0, %c0_0, %c0_1] : memref<2x32x256xf32, #tpu.memory_space<vmem>>, vector<2x32x256xf32>
    %cst = arith.constant dense<0.000000e+00> : vector<2x32xf32>
    %1 = vector.multi_reduction <add>, %0, %cst [2] : vector<2x32x256xf32> to vector<2x32xf32>
    %c0_2 = arith.constant 0 : index
    %c0_3 = arith.constant 0 : index
    %2 = vector.load %arg3[%c0_2, %c0_3] : memref<32x32xf32, #tpu.memory_space<vmem>>, vector<32x32xf32>
    %cst_4 = arith.constant dense<0.000000e+00> : vector<2x32xf32>
    %3 = tpu.matmul %1, %2, %cst_4 {dimension_numbers = #tpu.dot_dimension_numbers<[1], [0], [0], [1], [0, 0, 1, 1], [], []>} : vector<2x32xf32>, vector<32x32xf32>, vector<2x32xf32> -> vector<2x32xf32>
    %c0_5 = arith.constant 0 : index
    %c0_6 = arith.constant 0 : index
    %4 = vector.load %arg4[%c0_5, %c0_6] : memref<1x32xf32, #tpu.memory_space<vmem>>, vector<1x32xf32>
    %5 = vector.broadcast %4 : vector<1x32xf32> to vector<2x32xf32>
    %6 = arith.addf %3, %5 : vector<2x32xf32>
    %cst_7 = arith.constant 0.000000e+00 : f32
    %7 = vector.broadcast %cst_7 : f32 to vector<2x32xf32>
    %8 = arith.maximumf %6, %7 : vector<2x32xf32>
    %c0_8 = arith.constant 0 : index
    %c0_9 = arith.constant 0 : index
    %9 = vector.load %arg5[%c0_8, %c0_9] : memref<32x32xf32, #tpu.memory_space<vmem>>, vector<32x32xf32>
    %cst_10 = arith.constant dense<0.000000e+00> : vector<2x32xf32>
    %10 = tpu.matmul %8, %9, %cst_10 {dimension_numbers = #tpu.dot_dimension_numbers<[1], [0], [0], [1], [0, 0, 1, 1], [], []>} : vector<2x32xf32>, vector<32x32xf32>, vector<2x32xf32> -> vector<2x32xf32>
    %c0_11 = arith.constant 0 : index
    %c0_12 = arith.constant 0 : index
    %11 = vector.load %arg6[%c0_11, %c0_12] : memref<1x32xf32, #tpu.memory_space<vmem>>, vector<1x32xf32>
    %12 = vector.broadcast %11 : vector<1x32xf32> to vector<2x32xf32>
    %13 = arith.addf %10, %12 : vector<2x32xf32>
    %14 = arith.mulf %13, %13 : vector<2x32xf32>
    %cst_13 = arith.constant dense<0.000000e+00> : vector<2xf32>
    %15 = vector.multi_reduction <add>, %14, %cst_13 [1] : vector<2x32xf32> to vector<2xf32>
    %16 = vector.shape_cast %15 : vector<2xf32> to vector<2x1xf32>
    %17 = math.rsqrt %16 : vector<2x1xf32>
    %cst_14 = arith.constant 14.2857141 : f32
    %18 = vector.broadcast %cst_14 : f32 to vector<2x1xf32>
    %19 = arith.mulf %17, %18 : vector<2x1xf32>
    %20 = vector.broadcast %19 : vector<2x1xf32> to vector<2x32xf32>
    %21 = arith.mulf %13, %20 : vector<2x32xf32>
    %c0_15 = arith.constant 0 : index
    %c0_16 = arith.constant 0 : index
    %22 = vector.load %arg2[%c0_15, %c0_16] : memref<32x8xf32, #tpu.memory_space<vmem>>, vector<32x8xf32>
    %cst_17 = arith.constant dense<0.000000e+00> : vector<2x8xf32>
    %23 = tpu.matmul %21, %22, %cst_17 {dimension_numbers = #tpu.dot_dimension_numbers<[1], [0], [0], [1], [0, 0, 1, 1], [], []>} : vector<2x32xf32>, vector<32x8xf32>, vector<2x8xf32> -> vector<2x8xf32>
    %c0_18 = arith.constant 0 : index
    %c0_19 = arith.constant 0 : index
    %24 = vector.load %arg7[%c0_18, %c0_19] : memref<2x8xf32, #tpu.memory_space<vmem>>, vector<2x8xf32>
    tpu.vector_store %arg7[%c0_18, %c0_19], %23 {strides = array<i32>} : memref<2x8xf32, #tpu.memory_space<vmem>>, vector<2x8xf32>,
    return
  }
  func.func @transform_0(%arg0: i32) -> (i32, i32, i32) {
    %c0_i32 = arith.constant 0 : i32
    %c0_i32_0 = arith.constant 0 : i32
    %c0_i32_1 = arith.constant 0 : i32
    return %arg0, %c0_i32, %c0_i32_0 : i32, i32, i32
  }
  func.func @transform_1(%arg0: i32) -> (i32, i32) {
    %c0_i32 = arith.constant 0 : i32
    %c0_i32_0 = arith.constant 0 : i32
    %c0_i32_1 = arith.constant 0 : i32
    return %c0_i32, %c0_i32_0 : i32, i32
  }
  func.func @transform_2(%arg0: i32) -> (i32, i32) {
    %c0_i32 = arith.constant 0 : i32
    %c0_i32_0 = arith.constant 0 : i32
    %c0_i32_1 = arith.constant 0 : i32
    return %c0_i32, %c0_i32_0 : i32, i32
  }
  func.func @transform_3(%arg0: i32) -> (i32, i32) {
    %c0_i32 = arith.constant 0 : i32
    %c0_i32_0 = arith.constant 0 : i32
    %c0_i32_1 = arith.constant 0 : i32
    return %c0_i32, %c0_i32_0 : i32, i32
  }
  func.func @transform_4(%arg0: i32) -> (i32, i32) {
    %c0_i32 = arith.constant 0 : i32
    %c0_i32_0 = arith.constant 0 : i32
    %c0_i32_1 = arith.constant 0 : i32
    return %c0_i32, %c0_i32_0 : i32, i32
  }
  func.func @transform_5(%arg0: i32) -> (i32, i32) {
    %c0_i32 = arith.constant 0 : i32
    %c0_i32_0 = arith.constant 0 : i32
    %c0_i32_1 = arith.constant 0 : i32
    return %c0_i32, %c0_i32_0 : i32, i32
  }
  func.func @transform_6(%arg0: i32) -> (i32, i32) {
    %c0_i32 = arith.constant 0 : i32
    %c0_i32_0 = arith.constant 0 : i32
    return %arg0, %c0_i32 : i32, i32
  }
}

</mosaic_0001>

<bundles_post_ra>
// kernel: tpu_custom_call.1
= control target key start
LH: loop header
LB: loop body
LE: loop exit
PB: predicated region body
PF: predicated region fallthrough
CT: control target
= control target key end

     0   :  { %11 = vsyncpa [#allocation3], 0  ;;  %s654_s0 = inlined_call_operand.hbm [shape: f32[2,32,256], index: 0, kind: input, shape index: {}]   ;;  %s655_s1 = inlined_call_operand.vmem [shape: f32[32,8], index: 1, kind: input, shape index: {}]   ;;  %s656_s2 = inlined_call_operand.vmem [shape: f32[32,32], index: 2, kind: input, shape index: {}]   ;;  %s657_s3 = inlined_call_operand.vmem [shape: f32[1,32], index: 3, kind: input, shape index: {}]   ;;  %s658_s4 = inlined_call_operand.hbm [shape: f32[32,32], index: 4, kind: input, shape index: {}]   ;;  %s659_s5 = inlined_call_operand.vmem [shape: f32[1,32], index: 5, kind: input, shape index: {}]   ;;  %s660_s6 = inlined_call_operand.hbm [shape: f32[2,8], index: 6, kind: output, shape index: {}]  }
   0x1   :  { %12 = vsyncpa [#allocation6], 0 }
   0x2   :  { %13 = vsyncpa [#allocation4], 0  ;;  %s550_s21 = smov [#allocation2]  }
   0x3   :  { %s19_s22 = sshll.u32 %s550_s21, 4  ;;  %s20_s22 = int_to_ptr.vmem [resolvable:$true] %s19_s22 }
   0x4   :  { %s492_s23 = scalar_lea.vmem %s20_s22, 2048  ;;  %p497_p1 = scmp.lt.s32.totalorder %s20_s22, %s20_s22 }
   0x5   :  { %p493_p0 = scmp.ne.s32.totalorder %s20_s22, %s492_s23  ;;  %p498_p2 = scmp.lt.s32.totalorder %s492_s23, %s492_s23 }
   0x7   :  { %p499_p3 = por %p498_p2, %p497_p1 }
   0x9   :  { %p500_p4 = pnand %p499_p3, %p493_p0 }
   0xb   :  { %503 = shalt.err (!%p500_p4)
}
   0xc   :  { %s551_s24 = smov 256   ;;  %s552_s25 = smov 16  }
   0xd   :  { %25 = dma.hbm_to_vmem [thread:$0]  %s654_s0, 2048, %s20_s22, [#allocation3], %s551_s24, %s551_s24, %s552_s25  }
   0xe   :  { %s553_s28 = smov [#allocation5]  }
   0xf   :  { %s37_s29 = sshll.u32 %s553_s28, 4  ;;  %s38_s29 = int_to_ptr.vmem [resolvable:$true] %s37_s29 }
  0x10   :  { %s512_s30 = scalar_lea.vmem %s38_s29, 512  ;;  %p517_p6 = scmp.lt.s32.totalorder %s38_s29, %s38_s29 }
  0x11   :  { %p513_p5 = scmp.ne.s32.totalorder %s38_s29, %s512_s30  ;;  %p518_p7 = scmp.lt.s32.totalorder %s512_s30, %s512_s30 }
  0x13   :  { %p519_p8 = por %p518_p7, %p517_p6 }
  0x15   :  { %p520_p9 = pnand %p519_p8, %p513_p5 }
  0x17   :  { %523 = shalt.err (!%p520_p9)
}
  0x18   :  { %s554_s7 = smov 128   ;;  %s555_s8 = smov 8  }
  0x19   :  { %43 = dma.hbm_to_vmem [thread:$0]  %s658_s4, 512, %s38_s29, [#allocation6], %s554_s7, %s554_s7, %s555_s8  }
  0x1a   :  { %544 = dma.done.wait [#allocation3], 2048  }
  0x1b   :  { %545 = vsyncadd [#allocation3], 4294965248 }
  0x1c   :  { %546 = dma.done.wait [#allocation6], 512  }
  0x1d   :  { %547 = vsyncadd [#allocation6], 4294966784  ;;  %v60_v0 = vld [vmem:[#allocation2 + $0x40] sm:$0xff]  ;;  %v61_v1 = vld [vmem:[#allocation2 + $0x48] sm:$0xff]  ;;  %v556_v24 = vmov 0.0   ;;  %vm557_vm0 = vmmov 0   ;;  %v111_v30 = vlaneseq }
  0x1e   :  { %v52_v2 = vld [vmem:[#allocation2] sm:$0xff]  ;;  %v80_v3 = vadd.f32 %v61_v1, %v60_v0  ;;  %v53_v4 = vld [vmem:[#allocation2 + $0x8] sm:$0xff]  ;;  %v62_v5 = vld [vmem:[#allocation2 + $0x50] sm:$0xff]  ;;  %440 = vmatprep.subr.mxu0 %v556_v24  ;;  %451 = vmatprep.subr.mxu1 %v556_v24  ;;  %vm122_vm1 = vcmask 130112   ;;  %vm129_vm2 = vcmask 195712   ;;  %vm136_vm3 = vcmask 261312  }
  0x1f   :  { %v63_v6 = vld [vmem:[#allocation2 + $0x58] sm:$0xff]  ;;  %v68_v7 = vadd.f32 %v53_v4, %v52_v2  ;;  %v54_v8 = vld [vmem:[#allocation2 + $0x10] sm:$0xff]  ;;  %v64_v12 = vld [vmem:[#allocation2 + $0x60] sm:$0xff]  ;;  %448 = vmatprep.mubr.msk.f32.mxu0 %vm557_vm0, %v556_v24  ;;  %459 = vmatprep.mubr.msk.f32.mxu1 %vm557_vm0, %v556_v24  ;;  %v112_v31 = vand.u32 127, %v111_v30  ;;  %v114_v36 = vshrl.u32 %v111_v30, 7  ;;  %vm157_vm4 = vcmask 1041409  }
  0x20   :  { %v55_v9 = vld [vmem:[#allocation2 + $0x18] sm:$0xff]  ;;  %81 = vadd.xlane.f32.xlu1 %v80_v3  ;;  %v83_v10 = vadd.f32 %v63_v6, %v62_v5  ;;  %v65_v13 = vld [vmem:[#allocation2 + $0x68] sm:$0xff]  ;;  %v56_v14 = vld [vmem:[#allocation2 + $0x20] sm:$0xff]  ;;  %vm159_vm5 = vcmask 261120   ;;  %vm318_vm6 = vcmask 254976   ;;  %s558_s26 = smov [#allocation7]  }
  0x21   :  { %69 = vadd.xlane.f32.xlu0 %v68_v7  ;;  %v71_v11 = vadd.f32 %v55_v9, %v54_v8  ;;  %v57_v15 = vld [vmem:[#allocation2 + $0x28] sm:$0xff]  ;;  %v86_v16 = vadd.f32 %v65_v13, %v64_v12  ;;  %v66_v18 = vld [vmem:[#allocation2 + $0x70] sm:$0xff]  ;;  %v67_v19 = vld [vmem:[#allocation2 + $0x78] sm:$0xff]  ;;  %v117_v34 = vadd.s32 4294967288, %v112_v31  ;;  %v124_v35 = vadd.s32 4294967280, %v112_v31  ;;  %s410_s27 = sshll.u32 %s558_s26, 4  ;;  %s411_s27 = int_to_ptr.vmem [resolvable:$true] %s410_s27 }
  0x22   :  { %v74_v17 = vadd.f32 %v57_v15, %v56_v14  ;;  %v58_v20 = vld [vmem:[#allocation2 + $0x30] sm:$0xff]  ;;  %v59_v21 = vld [vmem:[#allocation2 + $0x38] sm:$0xff]  ;;  %v89_v22 = vadd.f32 %v67_v19, %v66_v18  ;;  %v93_v27 = vld [vmem:[%s656_s2 + $0x8] sm:$0xff]  ;;  %v131_v40 = vadd.s32 4294967272, %v112_v31  ;;  %v115_v42 = vsub.s32 %v112_v31, %v114_v36  ;;  %s524_s28 = scalar_lea.vmem %s411_s27, 32  ;;  %p529_p11 = scmp.lt.s32.totalorder %s411_s27, %s411_s27 }
  0x23   :  { %v77_v23 = vadd.f32 %v59_v21, %v58_v20  ;;  %v95_v25 = vld [vmem:[%s656_s2 + $0x18] sm:$0xff]  ;;  %v94_v26 = vld [vmem:[%s656_s2 + $0x10] sm:$0xff]  ;;  %v92_v28 = vld [vmem:[%s656_s2] sm:$0xff]  ;;  %v120_v38 = vsub.s32 %v117_v34, %v114_v36  ;;  %v127_v41 = vsub.s32 %v124_v35, %v114_v36  ;;  %vm402_vm7 = vcmask 58368   ;;  %p525_p10 = scmp.ne.s32.totalorder %s411_s27, %s524_s28  ;;  %p530_p12 = scmp.lt.s32.totalorder %s524_s28, %s524_s28 }
  0x24   :  { %84 = vadd.xlane.f32.xlu1 %v83_v10  ;;  %441 = vmatpush3.msra.mxu0 %v95_v25  ;;  %v236_v29 = vld [vmem:[#allocation5 + $0x18] sm:$0xff]  ;;  %v134_v46 = vsub.s32 %v131_v40, %v114_v36  ;;  %v235_v63 = vld [vmem:[#allocation5 + $0x10] sm:$0xff]  ;;  %v234_v0 = vld [vmem:[#allocation5 + $0x8] sm:$0xff] }
  0x25   :  { %72 = vadd.xlane.f32.xlu0 %v71_v11  ;;  %442 = vmatprep.subr.mxu0 %v556_v24  ;;  %v233_v1 = vld [vmem:[#allocation5] sm:$0xff]  ;;  %v328_v13 = vld [vmem:[%s655_s1 + $0x18] sm:$0xff]  ;;  %v327_v14 = vld [vmem:[%s655_s1 + $0x10] sm:$0xff]  ;;  %p531_p13 = por %p530_p12, %p529_p11 }
  0x26   :  { %443 = vmatpush3.msra.mxu0 %v94_v26  ;;  %452 = vmatpush3.msra.mxu1 %v236_v29  ;;  %v420_v2 = vld [vmem:[%s657_s3] ss:$0 sm:$0xff]  ;;  %v326_v15 = vld [vmem:[%s655_s1 + $0x8] sm:$0xff] }
  0x27   :  { %444 = vmatprep.subr.mxu0 %v556_v24  ;;  %453 = vmatprep.subr.mxu1 %v556_v24  ;;  %v422_v7 = vld [vmem:[%s659_s5] ss:$0 sm:$0xff]  ;;  %p532_p0 = pnand %p531_p13, %p525_p10 }
  0x28   :  { %87 = vadd.xlane.f32.xlu1 %v86_v16  ;;  %445 = vmatpush3.msra.mxu0 %v93_v27  ;;  %v325_v16 = vld [vmem:[%s655_s1] sm:$0xff] }
  0x29   :  { %75 = vadd.xlane.f32.xlu0 %v74_v17  ;;  %446 = vmatprep.subr.mxu0 %v556_v24 }
  0x2a   :  { %447 = vmatpush3.msra.mxu0 %v92_v28  ;;  %454 = vmatpush3.msra.mxu1 %v235_v63 }
  0x2b   :  { %462 = vmatprep.subr.mxu0 %v556_v24  ;;  %455 = vmatprep.subr.mxu1 %v556_v24 }
  0x2c   :  { %90 = vadd.xlane.f32.xlu1 %v89_v22  ;;  %456 = vmatpush3.msra.mxu1 %v234_v0 }
  0x2d   :  { %78 = vadd.xlane.f32.xlu0 %v77_v23  ;;  %457 = vmatprep.subr.mxu1 %v556_v24 }
  0x2e   :  { %458 = vmatpush3.msra.mxu1 %v233_v1 }
  0xa9   :  { %v82_v32 = vpop.xlane.xlu1 %81 }
  0xaa   :  { %v70_v33 = vpop.xlane.xlu0 %69  ;;  %v141_v49 = vrot.slane %v82_v32, %v115_v42 }
  0xab   :  { %v116_v51 = vrot.slane %v70_v33, %v115_v42 }
  0xad   :  { %v85_v37 = vpop.xlane.xlu1 %84 }
  0xae   :  { %v73_v39 = vpop.xlane.xlu0 %72  ;;  %v145_v44 = vrot.slane %v85_v37, %v120_v38 }
  0xaf   :  { %v121_v47 = vrot.slane %v73_v39, %v120_v38 }
  0xb0   :  { %v146_v53 = vsel %vm122_vm1, %v145_v44, %v141_v49 }
  0xb1   :  { %v88_v43 = vpop.xlane.xlu1 %87  ;;  %v123_v56 = vsel %vm122_vm1, %v121_v47, %v116_v51 }
  0xb2   :  { %v76_v45 = vpop.xlane.xlu0 %75  ;;  %v150_v48 = vrot.slane %v88_v43, %v127_v41 }
  0xb3   :  { %v128_v50 = vrot.slane %v76_v45, %v127_v41 }
  0xb4   :  { %v151_v57 = vsel %vm129_vm2, %v150_v48, %v146_v53 }
  0xb5   :  { %v91_v52 = vpop.xlane.xlu1 %90  ;;  %v130_v59 = vsel %vm129_vm2, %v128_v50, %v123_v56 }
  0xb6   :  { %v155_v54 = vrot.slane %v91_v52, %v134_v46  ;;  %v79_v55 = vpop.xlane.xlu0 %78 }
  0xb7   :  { %v135_v58 = vrot.slane %v79_v55, %v134_v46 }
  0xb8   :  { %v156_v60 = vsel %vm136_vm3, %v155_v54, %v151_v57 }
  0xb9   :  { %v137_v61 = vsel %vm136_vm3, %v135_v58, %v130_v59 }
  0xba   :  { %v158_v62 = vsel %vm157_vm4, %v156_v60, %v137_v61 }
  0xbb   :  { %449 = vmatmul.mubr.msk.f32.vlgmr.msra.gmra.mxu0 %vm159_vm5, %v158_v62 }
  0xbc   :  { %470 = vmatprep.mubr.msk.f32.mxu0 %vm557_vm0, %v556_v24  ;;  %463 = vmatpush3.msra.mxu0 %v328_v13 }
  0xbd   :  { %464 = vmatprep.subr.mxu0 %v556_v24 }
  0xbe   :  { %465 = vmatpush3.msra.mxu0 %v327_v14 }
  0xbf   :  { %466 = vmatprep.subr.mxu0 %v556_v24 }
  0xc0   :  { %467 = vmatpush3.msra.mxu0 %v326_v15 }
  0xc1   :  { %468 = vmatprep.subr.mxu0 %v556_v24 }
  0xc2   :  { %469 = vmatpush3.msra.mxu0 %v325_v16 }
 0x17b   :  { %v228_v3 = vpop.f32.mrf.mxu0 }
 0x17c   :  { %v229_v4 = vadd.f32 %v420_v2, %v228_v3 }
 0x17d   :  { %v450_v5 = vpop.f32.mrf.mxu0 }
 0x17e   :  { %v232_v6 = vmax.f32 %v229_v4, 0.0 }
 0x180   :  { %460 = vmatmul.mubr.msk.f32.vlgmr.msra.gmra.mxu1 %vm159_vm5, %v232_v6 }
 0x240   :  { %v313_v8 = vpop.f32.mrf.mxu1 }
 0x241   :  { %v314_v9 = vadd.f32 %v422_v7, %v313_v8 }
 0x242   :  { %v461_v10 = vpop.f32.mrf.mxu1 }
 0x243   :  { %v317_v11 = vmul.f32 %v314_v9, %v314_v9 }
 0x245   :  { %v319_v12 = vsel %vm318_vm6, %v317_v11, 0.0 }
 0x246   :  { %320 = vadd.xlane.f32.xlu0 %v319_v12 }
 0x2cf   :  { %v321_v17 = vpop.xlane.xlu0 %320 }
 0x2d0   :  { %482 = vrsqrt.f32 %v321_v17 }
 0x2dd   :  { %v483_v18 = vpop.eup %482 }
 0x2de   :  { %v323_v19 = vmul.f32 14.285714, %v483_v18 }
 0x2e0   :  { %v324_v20 = vmul.f32 %v323_v19, %v314_v9 }
 0x2e2   :  { %471 = vmatmul.mubr.msk.f32.vlgmr.msra.gmra.mxu0 %vm159_vm5, %v324_v20 }
 0x3a2   :  { %v398_v21 = vpop.f32.mrf.mxu0 }
 0x3a3   :  { %403 = vst.msk [vmem:[#allocation7] sm:$0x3] %vm402_vm7, %v398_v21 }
 0x3a4   :  { %v472_v22 = vpop.f32.mrf.mxu0 }
 0x3a5   :  { %535 = shalt.err (!%p532_p0)
}
 0x3a6   :  { %413 = dma.vmem_to_hbm [thread:$0]  %s411_s27, 32, %s660_s6, [#allocation4]  }
 0x3a7   :  { %548 = dma.done.wait [#allocation4], 32  }
 0x3a8   :  { %549 = vsyncadd [#allocation4], 4294967264 }
 0x3a9   :  { %417 = vsyncpa [#allocation3], 1 }
 0x3aa   :  { %418 = vsyncpa [#allocation6], 1 }
 0x3ab   :  { %419 = vsyncpa [#allocation4], 1 }

</bundles_post_ra>
